<compile_context>
chip_gen: v7x
topology: tpu7x:2x2x1
jax: 0.10.0
libtpu: 0.0.40
codegen_flags: <defaults>
</compile_context>

<pallas_src>
import math

import jax
import jax.numpy as jnp
from jax.experimental import pallas as pl
from jax.experimental.pallas import tpu as pltpu


def _round_up(x: int, m: int) -> int:
    return ((x + m - 1) // m) * m


def _expert_matmul_kernel(x_ref, w_ref, o_ref, acc_ref):
    # x_ref: (tm, tk), w_ref: (tk, tn), o_ref: (tm, tn), acc_ref: (tm, tn) f32
    k = pl.program_id(3)

    @pl.when(k == 0)
    def _():
        acc_ref[...] = jnp.zeros_like(acc_ref)

    acc_ref[...] += jnp.dot(
        x_ref[...], w_ref[...], preferred_element_type=jnp.float32
    )

    @pl.when(k == pl.num_programs(3) - 1)
    def _():
        o_ref[...] = acc_ref[...].astype(o_ref.dtype)


def _expert_matmul_kernel_single_k(x_ref, w_ref, o_ref):
    # Fast path when the whole contraction fits in one K tile: no scratch, no
    # accumulator round-trip through VMEM.
    o_ref[...] = jnp.dot(
        x_ref[...], w_ref[...], preferred_element_type=jnp.float32
    ).astype(o_ref.dtype)


def expert_fused_row_parallel_linear(
    x,
    weight,
    reduce_output: bool = True,
    expert_indices=None,
    compute_dtype=None,
):
    """output = einsum('e...h,ehi->e...i', x, weight); bias unsupported.

    x:      (E, ..., H)  (leading expert dim may be 1 -> broadcast, like torch einsum)
    weight: (num_experts, H, I); expert_indices optionally selects a subset.
    """
    if expert_indices is not None:
        weight = weight[expert_indices, :, :]

    E, H, I = weight.shape
    assert x.shape[-1] == H, "hidden dim mismatch"
    assert x.shape[0] in (1, E), "input/weight disagree on number of experts"
    if x.shape[0] == 1 and E > 1:
        x = jnp.broadcast_to(x, (E,) + x.shape[1:])

    inner = x.shape[1:-1]
    T = int(math.prod(inner)) if inner else 1
    out_dtype = jnp.result_type(x.dtype, weight.dtype)

    x2 = x.reshape(E, T, H)
    if compute_dtype is not None:
        x2 = x2.astype(compute_dtype)
        weight = weight.astype(compute_dtype)

    # --- Tile sizes: MXU-aligned, dtype-aware, VMEM-safe on v5e/v6e/v7x. ---
    itemsize = jnp.dtype(x2.dtype).itemsize
    sublane_mult = {4: 8, 2: 16, 1: 32}.get(itemsize, 8)
    tm = min(256, _round_up(T, sublane_mult))   # sublane-aligned
    tn = min(512, _round_up(I, 128))            # lane-dense output (unmasked vst)
    tk = min(512, _round_up(H, 128))            # lane multiple of 128

    T_p, H_p, I_p = _round_up(T, tm), _round_up(H, tk), _round_up(I, tn)

    if (T_p, H_p) != (T, H):
        x2 = jnp.pad(x2, ((0, 0), (0, T_p - T), (0, H_p - H)))
    if (H_p, I_p) != (H, I):
        weight = jnp.pad(weight, ((0, 0), (0, H_p - H), (0, I_p - I)))

    num_k = H_p // tk
    grid = (E, T_p // tm, I_p // tn, num_k)

    in_bytes = (x2.size * x2.dtype.itemsize
                + weight.size * weight.dtype.itemsize)
    out_bytes = E * T_p * I_p * jnp.dtype(out_dtype).itemsize

    if num_k == 1:
        kernel = _expert_matmul_kernel_single_k
        scratch_shapes = []
    else:
        kernel = _expert_matmul_kernel
        scratch_shapes = [pltpu.VMEM((tm, tn), jnp.float32)]

    out = pl.pallas_call(
        kernel,
        out_shape=jax.ShapeDtypeStruct((E, T_p, I_p), out_dtype),
        grid_spec=pltpu.PrefetchScalarGridSpec(
            num_scalar_prefetch=0,
            grid=grid,
            in_specs=[
                # expert dim squeezed (block dim None) -> kernel sees 2-D tiles
                pl.BlockSpec((None, tm, tk), lambda e, m, n, k: (e, m, k)),
                pl.BlockSpec((None, tk, tn), lambda e, m, n, k: (e, k, n)),
            ],
            out_specs=pl.BlockSpec((None, tm, tn), lambda e, m, n, k: (e, m, n)),
            scratch_shapes=scratch_shapes,
        ),
        compiler_params=pltpu.CompilerParams(
            dimension_semantics=("parallel", "parallel", "parallel", "arbitrary"),
            vmem_limit_bytes=32 * 1024 * 1024,  # safe on every generation incl. v7x
        ),
        cost_estimate=pl.CostEstimate(
            flops=2 * E * T_p * H_p * I_p,
            transcendentals=0,
            bytes_accessed=in_bytes + out_bytes,
        ),
    )(x2, weight)

    out = out[:, :T, :I].reshape((E,) + inner + (I,))

    if reduce_output:
        # TODO(synk): reduce_from_tensor_model_parallel_region (TP all-reduce) is a
        # multi-device collective; identity at TP size 1, so a no-op here.
        pass
    return out


def _init_expert_weight(key, num_experts, input_size, output_size, dtype=jnp.float32):
    # Mirrors _init_weight: kaiming_uniform_(weight[e], a=sqrt(5)) per (H, I) slice,
    # i.e. uniform(-bound, bound) with bound = 1/sqrt(fan_in), fan_in = output_size
    # (torch treats dim 1 of the 2-D slice as fan_in).
    bound = 1.0 / math.sqrt(output_size)
    return jax.random.uniform(
        key, (num_experts, input_size, output_size), dtype=dtype,
        minval=-bound, maxval=bound,
    )


if __name__ == "__main__":
    key = jax.random.PRNGKey(0)
    kx, kw = jax.random.split(key)

    # Small, deliberately non-(8,128)-aligned shapes to exercise the padding path.
    # E=4 experts, '...' token dims = (2, 8) -> 16 tokens, H=160, I=192.
    E, H, I = 4, 160, 192
    inner = (2, 8)

    x = jax.random.normal(kx, (E,) + inner + (H,), dtype=jnp.float32)
    w = _init_expert_weight(kw, E, H, I, dtype=jnp.float32)

    out = expert_fused_row_parallel_linear(x, w, reduce_output=True)
    out = jax.block_until_ready(out)

    ref = jnp.einsum("e...h,ehi->e...i", x, w)
    assert out.shape == (E,) + inner + (I,)
    assert jnp.allclose(out, ref, atol=1e-4, rtol=1e-4)

    # Also exercise the multi-K-step (accumulator) path and expert_indices gather.
    E2, H2, I2 = 8, 1152, 640          # H2 > tk=512 -> 3 K steps
    x2 = jax.random.normal(kx, (3, 4, H2), dtype=jnp.float32)  # broadcast expert dim
    w2 = _init_expert_weight(kw, E2, H2, I2, dtype=jnp.float32)
    idx = jnp.array([1, 3, 6], dtype=jnp.int32)
    x2e = x2[None]                      # (1, 3, 4, H2) -> broadcast to 3 experts
    out2 = expert_fused_row_parallel_linear(x2e, w2, expert_indices=idx)
    out2 = jax.block_until_ready(out2)
    ref2 = jnp.einsum("e...h,ehi->e...i",
                      jnp.broadcast_to(x2e, (3, 3, 4, H2)), w2[idx])
    assert jnp.allclose(out2, ref2, atol=1e-3, rtol=1e-3)

    print("KERNEL_OK")
</pallas_src>

<mosaic_0001>
module attributes {stable_mosaic.version = 11 : i64} {
  func.func @_expert_matmul_kernel_single_k(%arg0: i32, %arg1: i32, %arg2: i32, %arg3: i32, %arg4: memref<1x16x256xf32, #tpu.memory_space<vmem>>, %arg5: memref<1x256x256xf32, #tpu.memory_space<vmem>>, %arg6: memref<1x16x256xf32, #tpu.memory_space<vmem>>) attributes {dimension_semantics = [#tpu.dimension_semantics<parallel>, #tpu.dimension_semantics<parallel>, #tpu.dimension_semantics<parallel>, #tpu.dimension_semantics<arbitrary>], iteration_bounds = array<i64: 4, 1, 1, 1>, scalar_prefetch = 0 : i64, scratch_operands = 0 : i64, tpu.core_type = #tpu.core_type<tc>, window_params = [{transform_indices = @transform_0, window_bounds = array<i64: 1, 16, 256>}, {transform_indices = @transform_1, window_bounds = array<i64: 1, 256, 256>}, {transform_indices = @transform_2, window_bounds = array<i64: 1, 16, 256>}]} {
    %c0 = arith.constant 0 : index
    %c0_0 = arith.constant 0 : index
    %c0_1 = arith.constant 0 : index
    %0 = vector.load %arg4[%c0, %c0_0, %c0_1] : memref<1x16x256xf32, #tpu.memory_space<vmem>>, vector<1x16x256xf32>
    %1 = vector.shape_cast %0 : vector<1x16x256xf32> to vector<16x256xf32>
    %c0_2 = arith.constant 0 : index
    %c0_3 = arith.constant 0 : index
    %c0_4 = arith.constant 0 : index
    %2 = vector.load %arg5[%c0_2, %c0_3, %c0_4] : memref<1x256x256xf32, #tpu.memory_space<vmem>>, vector<1x256x256xf32>
    %3 = vector.shape_cast %2 : vector<1x256x256xf32> to vector<256x256xf32>
    %cst = arith.constant dense<0.000000e+00> : vector<16x256xf32>
    %4 = tpu.matmul %1, %3, %cst {dimension_numbers = #tpu.dot_dimension_numbers<[1], [0], [0], [1], [0, 0, 1, 1], [], []>} : vector<16x256xf32>, vector<256x256xf32>, vector<16x256xf32> -> vector<16x256xf32>
    %c0_5 = arith.constant 0 : index
    %c0_6 = arith.constant 0 : index
    %c0_7 = arith.constant 0 : index
    %5 = vector.load %arg6[%c0_5, %c0_6, %c0_7] : memref<1x16x256xf32, #tpu.memory_space<vmem>>, vector<1x16x256xf32>
    %6 = vector.shape_cast %5 : vector<1x16x256xf32> to vector<16x256xf32>
    %7 = vector.shape_cast %4 : vector<16x256xf32> to vector<1x16x256xf32>
    tpu.vector_store %arg6[%c0_5, %c0_6, %c0_7], %7 {strides = array<i32>} : memref<1x16x256xf32, #tpu.memory_space<vmem>>, vector<1x16x256xf32>,
    return
  }
  func.func @transform_0(%arg0: i32, %arg1: i32, %arg2: i32, %arg3: i32) -> (i32, i32, i32) {
    %c0_i32 = arith.constant 0 : i32
    return %arg0, %arg1, %arg3 : i32, i32, i32
  }
  func.func @transform_1(%arg0: i32, %arg1: i32, %arg2: i32, %arg3: i32) -> (i32, i32, i32) {
    %c0_i32 = arith.constant 0 : i32
    return %arg0, %arg3, %arg2 : i32, i32, i32
  }
  func.func @transform_2(%arg0: i32, %arg1: i32, %arg2: i32, %arg3: i32) -> (i32, i32, i32) {
    %c0_i32 = arith.constant 0 : i32
    return %arg0, %arg1, %arg2 : i32, i32, i32
  }
}

</mosaic_0001>

<bundles_post_ra>
// kernel: tpu_custom_call.1
= control target key start
LH: loop header
LB: loop body
LE: loop exit
PB: predicated region body
PF: predicated region fallthrough
CT: control target
= control target key end

     0   :  { %7 = vsyncpa [#allocation3], 0  ;;  %s1210_s0 = inlined_call_operand.hbm [shape: f32[4,16,256], index: 0, kind: input, shape index: {}]   ;;  %s1211_s1 = inlined_call_operand.hbm [shape: f32[4,256,256], index: 1, kind: input, shape index: {}]   ;;  %s1212_s2 = inlined_call_operand.hbm [shape: f32[4,16,256], index: 2, kind: output, shape index: {}]  }
   0x1   :  { %9 = vsyncpa [#allocation3 + $0x1], 0 }
   0x2   :  { %10 = vsyncpa [#allocation6], 0 }
   0x3   :  { %12 = vsyncpa [#allocation6 + $0x1], 0 }
   0x4   :  { %13 = vsyncpa [#allocation4], 0 }
   0x5   :  { %15 = vsyncpa [#allocation4 + $0x1], 0  ;;  %s905_s9 = smov 0   ;;  %s907_s10 = smov 0  }
   0x6   :  { %s909_s11 = smov 0   ;;  %s911_s12 = smov 0  }
   0x7   :  { %s913_s13 = smov 0   ;;  %s915_s14 = smov 0  }
   0x8 LB: > { %s546_s15 = sadd.s32 4294967295, %s881_s14   ;;  %s547_s16 = sadd.s32 4294967294, %s881_s14   ;;  %s881_s14 = sphi %s915_s14, %s21_s14   ;;  %s877_s13 = sphi %s913_s13, %s1229_s13   ;;  %s873_s12 = sphi %s911_s12, %s1228_s12   ;;  %s869_s11 = sphi %s909_s11, %s1227_s11   ;;  %s865_s10 = sphi %s907_s10, %s1226_s10   ;;  %s861_s9 = sphi %s905_s9, %s1225_s9  }
   0x9   : > { %s47_s17 = sadd.s32 1, %s877_s13  ;;  %s58_s18 = sadd.s32 1, %s869_s11 }
   0xa   : > { %p49_p0 = scmp.ge.s32.totalorder %s47_s17, 4  ;;  %p65_p1 = scmp.ne.s32.totalorder %s869_s11, %s865_s10 }
   0xb   : > { %p66_p2 = scmp.eq.s32.totalorder %s881_s14, 0  ;;  %p71_p3 = scmp.ne.s32.totalorder %s865_s10, %s861_s9 }
   0xc   : > { %s1231_s17 = smov (%p49_p0, %s47_s17), 0  ;;  %p72_p5 = scmp.eq.s32.totalorder %s546_s15, 0 }
   0xd   : > { %p946_p4 = por %p66_p2, %p65_p1  ;;  %s51_s20 = ssub.s32 %s877_s13, %s1231_s17 }
   0xe   : > { %p129_p6 = scmp.eq.s32.totalorder %s546_s15, 3  ;;  %p56_p7 = scmp.eq.s32.totalorder %s51_s20, 0 }
   0xf   : > { %p952_p8 = por %p72_p5, %p71_p3  ;;  %p135_p10 = scmp.eq.s32.totalorder %s547_s16, 3 }
  0x10   : > { %p956_p9 = por %p129_p6, %p65_p1  ;;  %p681_p12 = scmp.lt.s32.totalorder %s881_s14, 4 }
  0x11   : > { %s1216_s21 = scalar_select %p952_p8, 1, 0 }
  0x12   : > { %s1217_s22 = scalar_select %p956_p9, 1, 0 }
  0x13   : > { %s961_s23 = scalar_select %p56_p7, %s869_s11, %s58_s18  }
  0x14   : > { %p963_p11 = por %p135_p10, %p71_p3  ;;  %s969_s25 = sand.u32 1, %s869_s11  }
  0x15   : > { %s550_s26 = sshll.u32 %s969_s25, 5  ;;  %s565_s27 = sshll.u32 %s877_s13, 9 }
  0x16   : > { %s1218_s24 = scalar_select %p963_p11, 1, 0 }
  0x17   : > { %s976_s30 = scalar_lea.hbm %s1210_s0, %s565_s27  ;;  %s159_s3 = scalar_lea.vmem [#allocation2], %s550_s26 }
  0x18   : > { %s171_s4 = sshll.u32 %s159_s3, 4  ;;  %p982_p13 = pnand %p681_p12, %p946_p4  ;;  %s978_s4 = int_to_ptr.vmem [resolvable:$true] %s171_s4 }
  0x19   : > { %s156_s6 = scalar_lea.sflag [#allocation3], %s969_s25  ;;  %s735_s7 = scalar_lea.hbm %s976_s30, 512 }
  0x1a   : > { %p736_p1 = scmp.ne.s32.totalorder %s976_s30, %s735_s7  ;;  %p737_p2 = pneg %p982_p13 }
  0x1b   : > { %s740_s16 = scalar_lea.hbm %s1210_s0, 2048  ;;  %p741_p4 = scmp.lt.u32.totalorder %s976_s30, %s1210_s0 }
  0x1c   : > { %p738_p3 = pnand %p737_p2, %p736_p1  ;;  %p742_p6 = scmp.lt.u32.totalorder %s740_s16, %s735_s7 }
  0x1d   : > { %p744_p10 = scmp.lt.u32.totalorder %s735_s7, %s976_s30 }
  0x1e   : > { %p739_p5 = pneg %p738_p3  ;;  %p743_p7 = por %p742_p6, %p741_p4 }
  0x20   : > { %p745_p12 = por %p744_p10, %p743_p7 }
  0x22   : > { %p746_p0 = pnand %p745_p12, %p739_p5 }
  0x24   : > { %749 = shalt.err (!%p746_p0)
}
  0x25   : > { %s750_s20 = scalar_lea.vmem %s978_s4, 512  ;;  %s883_s26 = smov [#allocation2]  }
  0x26   : > { %p751_p1 = scmp.ne.s32.totalorder %s978_s4, %s750_s20  ;;  %s755_s27 = sshll.u32 %s883_s26, 4  ;;  %s756_s27 = int_to_ptr.vmem [resolvable:$false] %s755_s27 }
  0x27   : > { %s757_s28 = scalar_lea.vmem %s756_s27, 1024  ;;  %p758_p9 = scmp.lt.s32.totalorder %s978_s4, %s756_s27 }
  0x28   : > { %p753_p3 = pnand %p751_p1, %p737_p2  ;;  %p759_p4 = scmp.lt.s32.totalorder %s757_s28, %s750_s20 }
  0x2a   : > { %p754_p11 = pneg %p753_p3  ;;  %p760_p6 = por %p759_p4, %p758_p9 }
  0x2c   : > { %p761_p7 = pnand %p760_p6, %p754_p11 }
  0x2e   : > { %764 = shalt.err (!%p761_p7)
}
  0x2f   : > { %s884_s29 = smov 256   ;;  %s885_s3 = smov 16  }
  0x30   : > { %673 = dma.hbm_to_vmem [thread:$0]  (!%p982_p13), %s976_s30, 512, %s978_s4, %s156_s6, %s884_s29, %s884_s29, %s885_s3  }
  0x31   : > { %p205_p9 = scmp.lt.s32.totalorder %s881_s14, 5  ;;  %s553_s7 = sshll.u32 %s969_s25, 9 }
  0x32   : > { %s566_s8 = sshll.u32 %s877_s13, 13  ;;  %p1220_p11 = scmp.ge.s32.totalorder %s881_s14, 1 }
  0x33   : > { %s1030_s19 = scalar_lea.hbm %s1211_s1, %s566_s8  ;;  %s185_s20 = scalar_lea.vmem [#allocation5], %s553_s7 }
  0x34   : > { %p1023_p0 = pnand %p1220_p11, %p205_p9  ;;  %s197_s26 = sshll.u32 %s185_s20, 4  ;;  %s1032_s26 = int_to_ptr.vmem [resolvable:$true] %s197_s26 }
  0x35   : > { %s182_s30 = scalar_lea.sflag [#allocation6], %s969_s25  ;;  %s765_s4 = scalar_lea.hbm %s1030_s19, 8192 }
  0x36   : > { %p766_p5 = scmp.ne.s32.totalorder %s1030_s19, %s765_s4  ;;  %s770_s28 = scalar_lea.hbm %s1211_s1, 32768 }
  0x37   : > { %p771_p1 = scmp.lt.u32.totalorder %s1030_s19, %s1211_s1  ;;  %p772_p3 = scmp.lt.u32.totalorder %s770_s28, %s765_s4 }
  0x38   : > { %p768_p10 = pnand %p766_p5, %p737_p2  ;;  %p774_p6 = scmp.lt.u32.totalorder %s765_s4, %s1030_s19 }
  0x39   : > { %p773_p4 = por %p772_p3, %p771_p1 }
  0x3a   : > { %p769_p12 = pneg %p768_p10 }
  0x3b   : > { %p775_p7 = por %p774_p6, %p773_p4 }
  0x3d   : > { %p776_p9 = pnand %p775_p7, %p769_p12 }
  0x3f   : > { %779 = shalt.err (!%p776_p9)
}
  0x40   : > { %s780_s7 = scalar_lea.vmem %s1032_s26, 8192  ;;  %s886_s18 = smov [#allocation5]  }
  0x41   : > { %p781_p11 = scmp.ne.s32.totalorder %s1032_s26, %s780_s7  ;;  %s785_s20 = sshll.u32 %s886_s18, 4  ;;  %s786_s20 = int_to_ptr.vmem [resolvable:$false] %s785_s20 }
  0x42   : > { %s787_s6 = scalar_lea.vmem %s786_s20, 16384  ;;  %p788_p8 = scmp.lt.s32.totalorder %s1032_s26, %s786_s20 }
  0x43   : > { %p783_p5 = pnand %p781_p11, %p737_p2  ;;  %p789_p1 = scmp.lt.s32.totalorder %s787_s6, %s780_s7 }
  0x45   : > { %p784_p10 = pneg %p783_p5  ;;  %p790_p3 = por %p789_p1, %p788_p8 }
  0x47   : > { %p791_p4 = pnand %p790_p3, %p784_p10 }
  0x49   : > { %794 = shalt.err (!%p791_p4)
}
  0x4a   : > { %676 = dma.hbm_to_vmem [thread:$0]  (!%p982_p13), %s1030_s19, 8192, %s1032_s26, %s182_s30, %s884_s29, %s884_s29, %s885_s3  }
  0x4b   : > { %209 = sbr.rel (%p1023_p0) target bundleno = 381 (0x17d), region = 28  ;;  %s1066_s4 = sand.u32 (!%p1023_p0), 1, %s865_s10  }
  0x4c   : > { %s557_s27 = sshll.u32 (!%p1023_p0), %s1066_s4, 5  ;;  %s212_s5 = scalar_lea.sflag (!%p1023_p0), [#allocation3], %s1066_s4 }
  0x4d   : > { %s1072_s28 = scalar_lea.vmem (!%p1023_p0), [#allocation2], %s557_s27  ;;  %p1222_p8 = scmp.ne.s32.totalorder (!%p1023_p0), %s1216_s21, 0 }
  0x52   : > { %848 = dma.done.wait (%p1222_p8), %s212_s5, 512  }
  0x53   : > { %850 = vsyncadd (%p1222_p8), %s212_s5, 4294966784  ;;  %s558_s25 = sshll.u32 %s1066_s4, 9  ;;  %s221_s29 = scalar_lea.sflag [#allocation6], %s1066_s4 }
  0x54   : > { %s1080_s3 = scalar_lea.vmem [#allocation5], %s558_s25 }
  0x55   : > { %852 = dma.done.wait (%p1222_p8), %s221_s29, 8192  }
  0x56   : > { %854 = vsyncadd (%p1222_p8), %s221_s29, 4294959104  ;;  %v261_v0 = vld [vmem:[%s1080_s3 + $0x8] sm:$0xff]  ;;  %v263_v1 = vld [vmem:[%s1080_s3 + $0x18] sm:$0xff]  ;;  %s249_s21 = scalar_lea.vmem [#allocation7], %s557_s27  ;;  %s567_s19 = sshll.u32 %s873_s12, 9 }
  0x57   : > { %v260_v2 = vld [vmem:[%s1080_s3] sm:$0xff]  ;;  %v568_v3 = vpack.c.bf16 %v263_v1, %v261_v0  ;;  %v262_v4 = vld [vmem:[%s1080_s3 + $0x10] sm:$0xff]  ;;  %v265_v5 = vld [vmem:[%s1080_s3 + $0x28] sm:$0xff]  ;;  %s424_s15 = sshll.u32 %s249_s21, 4  ;;  %s1162_s8 = scalar_lea.hbm %s1212_s2, %s567_s19  ;;  %s1157_s15 = int_to_ptr.vmem [resolvable:$true] %s424_s15 }
  0x58   : > { %v267_v6 = vld [vmem:[%s1080_s3 + $0x38] sm:$0xff]  ;;  %v570_v7 = vpack.c.bf16 %v262_v4, %v260_v2  ;;  %v264_v9 = vld [vmem:[%s1080_s3 + $0x20] sm:$0xff]  ;;  %v266_v10 = vld [vmem:[%s1080_s3 + $0x30] sm:$0xff]  ;;  %s406_s16 = scalar_lea.sflag [#allocation4], %s1066_s4  ;;  %s795_s12 = scalar_lea.vmem %s1157_s15, 512 }
  0x59   : > { %v572_v8 = vpack.c.bf16 %v267_v6, %v265_v5  ;;  %v269_v11 = vld [vmem:[%s1080_s3 + $0x48] sm:$0xff]  ;;  %569 = vmatprep.subr.bf16.mxu0 %v568_v3  ;;  %632 = vmatprep.subr.bf16.mxu1 %v568_v3  ;;  %v271_v12 = vld [vmem:[%s1080_s3 + $0x58] sm:$0xff]  ;;  %v574_v13 = vpack.c.bf16 %v266_v10, %v264_v9  ;;  %v268_v15 = vld [vmem:[%s1080_s3 + $0x40] sm:$0xff]  ;;  %p796_p13 = scmp.ne.s32.totalorder %s1157_s15, %s795_s12  ;;  %p1223_p2 = scmp.ne.s32.totalorder %s1217_s22, 0 }
  0x5a   : > { %571 = vmatpush1.bf16.msra.mxu0 %v570_v7  ;;  %648 = vmatpush1.bf16.msra.mxu1 %v570_v7  ;;  %v576_v14 = vpack.c.bf16 %v271_v12, %v269_v11  ;;  %v270_v16 = vld [vmem:[%s1080_s3 + $0x50] sm:$0xff]  ;;  %v273_v17 = vld [vmem:[%s1080_s3 + $0x68] sm:$0xff]  ;;  %v275_v18 = vld [vmem:[%s1080_s3 + $0x78] sm:$0xff]  ;;  %s887_s7 = smov [#allocation7]  }
  0x5b   : > { %573 = vmatprep.subr.bf16.mxu0 %v572_v8  ;;  %633 = vmatprep.subr.bf16.mxu1 %v572_v8  ;;  %v578_v19 = vpack.c.bf16 %v270_v16, %v268_v15  ;;  %v580_v20 = vpack.c.bf16 %v275_v18, %v273_v17  ;;  %v272_v21 = vld [vmem:[%s1080_s3 + $0x60] sm:$0xff]  ;;  %v274_v22 = vld [vmem:[%s1080_s3 + $0x70] sm:$0xff]  ;;  %v277_v23 = vld [vmem:[%s1080_s3 + $0x88] sm:$0xff]  ;;  %p797_p0 = pnand %p796_p13, %p1223_p2  ;;  %s799_s18 = sshll.u32 %s887_s7, 4  ;;  %s800_s18 = int_to_ptr.vmem [resolvable:$false] %s799_s18 }
  0x5c   : > { %v279_v24 = vld [vmem:[%s1080_s3 + $0x98] sm:$0xff]  ;;  %v582_v25 = vpack.c.bf16 %v274_v22, %v272_v21  ;;  %v276_v27 = vld [vmem:[%s1080_s3 + $0x80] sm:$0xff]  ;;  %v278_v28 = vld [vmem:[%s1080_s3 + $0x90] sm:$0xff]  ;;  %s801_s20 = scalar_lea.vmem %s800_s18, 1024  ;;  %p802_p6 = scmp.lt.s32.totalorder %s1157_s15, %s800_s18 }
  0x5d   : > { %v584_v26 = vpack.c.bf16 %v279_v24, %v277_v23  ;;  %v281_v29 = vld [vmem:[%s1080_s3 + $0xa8] sm:$0xff]  ;;  %v283_v30 = vld [vmem:[%s1080_s3 + $0xb8] sm:$0xff]  ;;  %v586_v31 = vpack.c.bf16 %v278_v28, %v276_v27  ;;  %v280_v33 = vld [vmem:[%s1080_s3 + $0xa0] sm:$0xff]  ;;  %p798_p12 = pneg %p797_p0  ;;  %p803_p7 = scmp.lt.s32.totalorder %s801_s20, %s795_s12 }
  0x5e   : > { %575 = vmatpush1.bf16.msra.mxu0 %v574_v13  ;;  %649 = vmatpush1.bf16.msra.mxu1 %v574_v13  ;;  %v588_v32 = vpack.c.bf16 %v283_v30, %v281_v29  ;;  %v282_v34 = vld [vmem:[%s1080_s3 + $0xb0] sm:$0xff]  ;;  %v285_v35 = vld [vmem:[%s1080_s3 + $0xc8] sm:$0xff]  ;;  %v287_v36 = vld [vmem:[%s1080_s3 + $0xd8] sm:$0xff] }
  0x5f   : > { %577 = vmatprep.subr.bf16.mxu0 %v576_v14  ;;  %634 = vmatprep.subr.bf16.mxu1 %v576_v14  ;;  %v590_v37 = vpack.c.bf16 %v282_v34, %v280_v33  ;;  %v284_v38 = vld [vmem:[%s1080_s3 + $0xc0] sm:$0xff]  ;;  %v592_v39 = vpack.c.bf16 %v287_v36, %v285_v35  ;;  %v286_v40 = vld [vmem:[%s1080_s3 + $0xd0] sm:$0xff]  ;;  %v257_v41 = vld [vmem:[%s1072_s28 + $0x8] sm:$0xff]  ;;  %p804_p9 = por %p803_p7, %p802_p6 }
  0x60   : > { %v259_v42 = vld [vmem:[%s1072_s28 + $0x18] sm:$0xff]  ;;  %v289_v43 = vld [vmem:[%s1080_s3 + $0xe8] sm:$0xff]  ;;  %388 = vmatprep.mubr.f32.mxu0 %v257_v41  ;;  %v594_v45 = vpack.c.bf16 %v286_v40, %v284_v38  ;;  %v288_v47 = vld [vmem:[%s1080_s3 + $0xe0] sm:$0xff] }
  0x61   : > { %v291_v44 = vld [vmem:[%s1080_s3 + $0xf8] sm:$0xff]  ;;  %394 = vmatprep.mubr.f32.mxu1 %v259_v42  ;;  %v290_v48 = vld [vmem:[%s1080_s3 + $0xf0] sm:$0xff]  ;;  %v293_v49 = vld [vmem:[%s1080_s3 + $0x108] sm:$0xff]  ;;  %p805_p11 = pnand %p804_p9, %p798_p12 }
  0x62   : > { %579 = vmatpush1.bf16.msra.mxu0 %v578_v19  ;;  %650 = vmatpush1.bf16.msra.mxu1 %v578_v19  ;;  %v596_v46 = vpack.c.bf16 %v291_v44, %v289_v43  ;;  %v295_v50 = vld [vmem:[%s1080_s3 + $0x118] sm:$0xff]  ;;  %v598_v51 = vpack.c.bf16 %v290_v48, %v288_v47  ;;  %v292_v53 = vld [vmem:[%s1080_s3 + $0x100] sm:$0xff]  ;;  %v294_v54 = vld [vmem:[%s1080_s3 + $0x110] sm:$0xff] }
  0x63   : > { %581 = vmatprep.subr.bf16.mxu0 %v580_v20  ;;  %635 = vmatprep.subr.bf16.mxu1 %v580_v20  ;;  %v600_v52 = vpack.c.bf16 %v295_v50, %v293_v49  ;;  %v297_v55 = vld [vmem:[%s1080_s3 + $0x128] sm:$0xff]  ;;  %v299_v56 = vld [vmem:[%s1080_s3 + $0x138] sm:$0xff]  ;;  %v602_v57 = vpack.c.bf16 %v294_v54, %v292_v53  ;;  %v296_v59 = vld [vmem:[%s1080_s3 + $0x120] sm:$0xff] }
  0x64   : > { %v604_v58 = vpack.c.bf16 %v299_v56, %v297_v55  ;;  %v298_v60 = vld [vmem:[%s1080_s3 + $0x130] sm:$0xff]  ;;  %v301_v61 = vld [vmem:[%s1080_s3 + $0x148] sm:$0xff]  ;;  %v303_v62 = vld [vmem:[%s1080_s3 + $0x158] sm:$0xff] }
  0x65   : > { %v606_v63 = vpack.c.bf16 %v298_v60, %v296_v59  ;;  %v608_v0 = vpack.c.bf16 %v303_v62, %v301_v61  ;;  %v300_v1 = vld [vmem:[%s1080_s3 + $0x140] sm:$0xff]  ;;  %v302_v2 = vld [vmem:[%s1080_s3 + $0x150] sm:$0xff]  ;;  %v305_v3 = vld [vmem:[%s1080_s3 + $0x168] sm:$0xff] }
  0x66   : > { %583 = vmatpush1.bf16.msra.mxu0 %v582_v25  ;;  %651 = vmatpush1.bf16.msra.mxu1 %v582_v25  ;;  %v307_v4 = vld [vmem:[%s1080_s3 + $0x178] sm:$0xff]  ;;  %v610_v5 = vpack.c.bf16 %v302_v2, %v300_v1  ;;  %v304_v7 = vld [vmem:[%s1080_s3 + $0x160] sm:$0xff]  ;;  %v306_v8 = vld [vmem:[%s1080_s3 + $0x170] sm:$0xff] }
  0x67   : > { %585 = vmatprep.subr.bf16.mxu0 %v584_v26  ;;  %636 = vmatprep.subr.bf16.mxu1 %v584_v26  ;;  %v612_v6 = vpack.c.bf16 %v307_v4, %v305_v3  ;;  %v309_v9 = vld [vmem:[%s1080_s3 + $0x188] sm:$0xff]  ;;  %v311_v10 = vld [vmem:[%s1080_s3 + $0x198] sm:$0xff]  ;;  %v614_v11 = vpack.c.bf16 %v306_v8, %v304_v7  ;;  %v308_v13 = vld [vmem:[%s1080_s3 + $0x180] sm:$0xff] }
  0x68   : > { %v616_v12 = vpack.c.bf16 %v311_v10, %v309_v9  ;;  %v310_v14 = vld [vmem:[%s1080_s3 + $0x190] sm:$0xff]  ;;  %v313_v15 = vld [vmem:[%s1080_s3 + $0x1a8] sm:$0xff]  ;;  %v315_v16 = vld [vmem:[%s1080_s3 + $0x1b8] sm:$0xff] }
  0x69   : > { %v618_v17 = vpack.c.bf16 %v310_v14, %v308_v13  ;;  %v620_v18 = vpack.c.bf16 %v315_v16, %v313_v15  ;;  %v312_v19 = vld [vmem:[%s1080_s3 + $0x1a0] sm:$0xff]  ;;  %v314_v20 = vld [vmem:[%s1080_s3 + $0x1b0] sm:$0xff]  ;;  %v317_v21 = vld [vmem:[%s1080_s3 + $0x1c8] sm:$0xff] }
  0x6a   : > { %587 = vmatpush1.bf16.msra.mxu0 %v586_v31  ;;  %652 = vmatpush1.bf16.msra.mxu1 %v586_v31  ;;  %v319_v22 = vld [vmem:[%s1080_s3 + $0x1d8] sm:$0xff]  ;;  %v622_v23 = vpack.c.bf16 %v314_v20, %v312_v19  ;;  %v316_v25 = vld [vmem:[%s1080_s3 + $0x1c0] sm:$0xff]  ;;  %v318_v26 = vld [vmem:[%s1080_s3 + $0x1d0] sm:$0xff] }
  0x6b   : > { %589 = vmatprep.subr.bf16.mxu0 %v588_v32  ;;  %637 = vmatprep.subr.bf16.mxu1 %v588_v32  ;;  %v624_v24 = vpack.c.bf16 %v319_v22, %v317_v21  ;;  %v321_v27 = vld [vmem:[%s1080_s3 + $0x1e8] sm:$0xff]  ;;  %v323_v28 = vld [vmem:[%s1080_s3 + $0x1f8] sm:$0xff]  ;;  %v626_v29 = vpack.c.bf16 %v318_v26, %v316_v25  ;;  %v320_v31 = vld [vmem:[%s1080_s3 + $0x1e0] sm:$0xff] }
  0x6c   : > { %v628_v30 = vpack.c.bf16 %v323_v28, %v321_v27  ;;  %v322_v32 = vld [vmem:[%s1080_s3 + $0x1f0] sm:$0xff]  ;;  %v256_v34 = vld [vmem:[%s1072_s28] sm:$0xff] }
  0x6d   : > { %v630_v33 = vpack.c.bf16 %v322_v32, %v320_v31  ;;  %v258_v35 = vld [vmem:[%s1072_s28 + $0x10] sm:$0xff] }
  0x6e   : > { %591 = vmatpush1.bf16.msra.mxu0 %v590_v37  ;;  %653 = vmatpush1.bf16.msra.mxu1 %v590_v37 }
  0x6f   : > { %593 = vmatprep.subr.bf16.mxu0 %v592_v39  ;;  %638 = vmatprep.subr.bf16.mxu1 %v592_v39 }
  0x72   : > { %595 = vmatpush1.bf16.msra.mxu0 %v594_v45  ;;  %654 = vmatpush1.bf16.msra.mxu1 %v594_v45 }
  0x73   : > { %597 = vmatprep.subr.bf16.mxu0 %v596_v46  ;;  %639 = vmatprep.subr.bf16.mxu1 %v596_v46 }
  0x76   : > { %599 = vmatpush1.bf16.msra.mxu0 %v598_v51  ;;  %655 = vmatpush1.bf16.msra.mxu1 %v598_v51 }
  0x77   : > { %601 = vmatprep.subr.bf16.mxu0 %v600_v52  ;;  %640 = vmatprep.subr.bf16.mxu1 %v600_v52 }
  0x7a   : > { %603 = vmatpush1.bf16.msra.mxu0 %v602_v57  ;;  %656 = vmatpush1.bf16.msra.mxu1 %v602_v57 }
  0x7b   : > { %605 = vmatprep.subr.bf16.mxu0 %v604_v58  ;;  %641 = vmatprep.subr.bf16.mxu1 %v604_v58 }
  0x7e   : > { %607 = vmatpush1.bf16.msra.mxu0 %v606_v63  ;;  %657 = vmatpush1.bf16.msra.mxu1 %v606_v63 }
  0x7f   : > { %609 = vmatprep.subr.bf16.mxu0 %v608_v0  ;;  %642 = vmatprep.subr.bf16.mxu1 %v608_v0 }
  0x82   : > { %611 = vmatpush1.bf16.msra.mxu0 %v610_v5  ;;  %658 = vmatpush1.bf16.msra.mxu1 %v610_v5 }
  0x83   : > { %613 = vmatprep.subr.bf16.mxu0 %v612_v6  ;;  %643 = vmatprep.subr.bf16.mxu1 %v612_v6 }
  0x86   : > { %615 = vmatpush1.bf16.msra.mxu0 %v614_v11  ;;  %659 = vmatpush1.bf16.msra.mxu1 %v614_v11 }
  0x87   : > { %617 = vmatprep.subr.bf16.mxu0 %v616_v12  ;;  %644 = vmatprep.subr.bf16.mxu1 %v616_v12 }
  0x8a   : > { %619 = vmatpush1.bf16.msra.mxu0 %v618_v17  ;;  %660 = vmatpush1.bf16.msra.mxu1 %v618_v17 }
  0x8b   : > { %621 = vmatprep.subr.bf16.mxu0 %v620_v18  ;;  %645 = vmatprep.subr.bf16.mxu1 %v620_v18 }
  0x8e   : > { %623 = vmatpush1.bf16.msra.mxu0 %v622_v23  ;;  %661 = vmatpush1.bf16.msra.mxu1 %v622_v23 }
  0x8f   : > { %625 = vmatprep.subr.bf16.mxu0 %v624_v24  ;;  %646 = vmatprep.subr.bf16.mxu1 %v624_v24 }
  0x92   : > { %627 = vmatpush1.bf16.msra.mxu0 %v626_v29  ;;  %662 = vmatpush1.bf16.msra.mxu1 %v626_v29 }
  0x93   : > { %629 = vmatprep.subr.bf16.mxu0 %v628_v30  ;;  %647 = vmatprep.subr.bf16.mxu1 %v628_v30 }
  0x96   : > { %631 = vmatpush1.bf16.msra.mxu0 %v630_v33  ;;  %663 = vmatpush1.bf16.msra.mxu1 %v630_v33 }
  0x99   : > { %389 = vmatmul.mubr.f32.vlgmr.msra.gmra.mrb[0].mxu0 %v256_v34  ;;  %395 = vmatmul.mubr.f32.vlgmr.msra.gmra.mrb[0].mxu1 %v258_v35 }
 0x16c   : > { %v390_v36 = vpop.f32.mrb[0].mxu0  ;;  %v396_v37 = vpop.f32.mrb[0].mxu1 }
 0x16d   : > { %401 = vst [vmem:[%s249_s21] sm:$0xff] %v390_v36  ;;  %403 = vst [vmem:[%s249_s21 + $0x10] sm:$0xff] %v396_v37  ;;  %v392_v38 = vpop.f32.mrb[1].mxu0  ;;  %v398_v39 = vpop.f32.mrb[1].mxu1 }
 0x16e   : > { %402 = vst [vmem:[%s249_s21 + $0x8] sm:$0xff] %v392_v38  ;;  %404 = vst [vmem:[%s249_s21 + $0x18] sm:$0xff] %v398_v39 }
 0x16f   : > { %808 = shalt.err (!%p805_p11)
}
 0x170   : > { %s809_s6 = scalar_lea.hbm %s1162_s8, 512  ;;  %s813_s28 = scalar_lea.hbm %s1212_s2, 2048 }
 0x171   : > { %p810_p5 = scmp.ne.s32.totalorder %s1162_s8, %s809_s6  ;;  %p814_p3 = scmp.lt.u32.totalorder %s1162_s8, %s1212_s2 }
 0x172   : > { %p815_p4 = scmp.lt.u32.totalorder %s813_s28, %s809_s6  ;;  %p817_p13 = scmp.lt.u32.totalorder %s809_s6, %s1162_s8 }
 0x173   : > { %p811_p10 = pnand %p810_p5, %p1223_p2 }
 0x174   : > { %p816_p8 = por %p815_p4, %p814_p3 }
 0x175   : > { %p812_p1 = pneg %p811_p10 }
 0x176   : > { %p818_p0 = por %p817_p13, %p816_p8 }
 0x178   : > { %p819_p12 = pnand %p818_p0, %p812_p1 }
 0x17a   : > { %822 = shalt.err (!%p819_p12)
}
 0x17b   : > { %s888_s3 = smov 256   ;;  %s889_s21 = smov 16  }
 0x17c   : > { %668 = dma.vmem_to_hbm [thread:$0]  (%p1223_p2), %s1157_s15, 512, %s1162_s8, %s406_s16, %s888_s3, %s888_s3, %s889_s21  }
 0x17d PF: > { %p682_p6 = scmp.ge.s32.totalorder %s881_s14, 2  ;;  %s439_s19 = sand.u32 1, %s861_s9  }
 0x17e   : > { %p1224_p7 = scmp.ne.s32.totalorder %s1218_s24, 0  ;;  %s440_s26 = scalar_lea.sflag [#allocation4], %s439_s19 }
 0x180   : > { %p678_p9 = pnand %p682_p6, %p1224_p7 }
 0x182   : > { %856 = dma.done.wait (!%p678_p9), %s440_s26, 512  }
 0x183   : > { %858 = vsyncadd (!%p678_p9), %s440_s26, 4294966784  ;;  %s21_s14 = sadd.s32 1, %s881_s14   ;;  %s1225_s9 = smov %s865_s10 }
 0x184   : > { %p18_p11 = scmp.ge.s32.totalorder %s21_s14, 6   ;;  %s1226_s10 = smov %s869_s11 }
 0x185   : > { %s1227_s11 = smov %s961_s23  ;;  %s1228_s12 = smov %s877_s13 }
 0x186   : > { %s1229_s13 = smov %s1231_s17  ;;  %20 = sbr.rel (!%p18_p11) target bundleno = 8 (0x8), region = 86 }
 0x18d   :  { %445 = vsyncpa [#allocation3], 1 }
 0x18e   :  { %447 = vsyncpa [#allocation3 + $0x1], 1 }
 0x18f   :  { %448 = vsyncpa [#allocation6], 1 }
 0x190   :  { %450 = vsyncpa [#allocation6 + $0x1], 1 }
 0x191   :  { %451 = vsyncpa [#allocation4], 1 }
 0x192   :  { %453 = vsyncpa [#allocation4 + $0x1], 1 }

</bundles_post_ra>
